<compile_context>
chip_gen: v5e
topology: v5e:2x2
jax: 0.10.0
libtpu: 0.0.40
codegen_flags: <defaults>
</compile_context>

<pallas_src>
import jax
import jax.numpy as jnp
from jax.experimental import pallas as pl
from jax.experimental.pallas import tpu as pltpu


def _rnn_dropout_kernel(x_ref, mask_ref, o_ref):
    """Multiply one (1, S_tile, F) activation block by its batch-row mask.

    mask_ref holds the full (B, F) mask; its index_map is constant so it is
    DMA'd once and stays resident in VMEM.  The mask is broadcast across the
    seq (sublane) axis, which is exactly the "consistent on seq_len" contract.
    """
    b = pl.program_id(0)
    m = mask_ref[pl.ds(b, 1), :]                 # (1, F) mask for this batch row
    o_ref[...] = x_ref[...] * m[:, None, :]      # broadcast over seq, native dtype


def _choose_seq_tile(seq_len: int, feat: int, itemsize: int) -> int:
    """Pick a seq tile giving ~2 MiB blocks, a multiple of the sublane packing."""
    target_bytes = 2 * 1024 * 1024
    max_rows = max(1, target_bytes // max(1, feat * itemsize))
    if seq_len <= max_rows:
        return seq_len
    pack = 8 if itemsize >= 4 else (16 if itemsize == 2 else 32)
    tile = (max_rows // pack) * pack
    return int(max(pack, min(tile, seq_len)))


def rnn_dropout(x, *, p: float = 0.5, training: bool = True, seed: int = 0,
                donate_input: bool = False):
    """Pallas implementation of RNNDropout.forward.

    x: (batch, seq, *features).  The same dropout mask is used at every seq
    position (inverted dropout, scaled by 1/(1-p)).
    """
    if (not training) or p == 0.0:
        return x
    if p >= 1.0:
        # PyTorch's bernoulli_(0).div_(0) would yield NaN/Inf; dropout with
        # p=1 keeps nothing, so return zeros.
        return jnp.zeros_like(x)

    orig_shape = x.shape
    B, S = orig_shape[0], orig_shape[1]
    F = 1
    for d in orig_shape[2:]:
        F *= int(d)
    x3 = x.reshape(B, S, F)
    itemsize = jnp.dtype(x.dtype).itemsize

    # (B, F) inverted-dropout mask, shared across the seq axis.
    keep_prob = 1.0 - p
    key = jax.random.PRNGKey(seed)
    keep = jax.random.bernoulli(key, keep_prob, (B, F))
    mask = (keep.astype(jnp.float32) * (1.0 / keep_prob)).astype(x.dtype)

    s_tile = _choose_seq_tile(S, F, itemsize)
    grid = (B, pl.cdiv(S, s_tile))

    block_bytes = s_tile * F * itemsize
    mask_bytes = B * F * itemsize
    # in + out double buffers + resident mask + slack, clamped to sane bounds.
    vmem_limit = int(min(64 * 2**20,
                         max(8 * 2**20,
                             6 * block_bytes + 2 * mask_bytes + (2 << 20))))

    total_bytes = B * S * F * itemsize
    cost = pl.CostEstimate(
        flops=B * S * F,
        transcendentals=0,
        bytes_accessed=2 * total_bytes + mask_bytes,
    )

    out = pl.pallas_call(
        _rnn_dropout_kernel,
        out_shape=jax.ShapeDtypeStruct((B, S, F), x.dtype),
        grid=grid,
        in_specs=[
            pl.BlockSpec((1, s_tile, F), lambda b, s: (b, s, 0)),
            pl.BlockSpec((B, F), lambda b, s: (0, 0)),   # full mask, resident
        ],
        out_specs=pl.BlockSpec((1, s_tile, F), lambda b, s: (b, s, 0)),
        compiler_params=pltpu.CompilerParams(
            dimension_semantics=("parallel", "parallel"),
            vmem_limit_bytes=vmem_limit,
        ),
        cost_estimate=cost,
        input_output_aliases=({0: 0} if donate_input else {}),
    )(x3, mask)

    return out.reshape(orig_shape)


if __name__ == "__main__":
    key = jax.random.PRNGKey(0)
    B, S, F = 2, 8, 32
    x = jax.random.normal(key, (B, S, F), dtype=jnp.float32)

    out = rnn_dropout(x, p=0.5, training=True, seed=0)
    out = jax.block_until_ready(out)
    assert out.shape == x.shape

    # Mask is either 0 or 1/(1-p) = 2.0, and is constant along the seq axis.
    ratio = out / x                                    # x ~ N(0,1): nonzero a.s.
    assert bool(jnp.allclose(ratio, ratio[:, :1, :], atol=1e-5))
    vals_ok = jnp.logical_or(jnp.isclose(ratio, 0.0, atol=1e-5),
                             jnp.isclose(ratio, 2.0, atol=1e-5))
    assert bool(jnp.all(vals_ok))

    # Multi-dim feature case (B, S, C, H): mask shared across seq, per (C, H).
    x4 = jax.random.normal(jax.random.PRNGKey(1), (2, 8, 4, 16), dtype=jnp.float32)
    out4 = jax.block_until_ready(rnn_dropout(x4, p=0.5, training=True, seed=3))
    r4 = out4 / x4
    assert out4.shape == x4.shape
    assert bool(jnp.allclose(r4, r4[:, :1], atol=1e-5))

    # Eval mode / p == 0 passthrough, p == 1 zeros.
    assert bool(jnp.allclose(rnn_dropout(x, p=0.5, training=False), x))
    assert bool(jnp.allclose(rnn_dropout(x, p=0.0, training=True), x))
    assert bool(jnp.all(rnn_dropout(x, p=1.0, training=True, seed=0) == 0.0))

    print("KERNEL_OK")
</pallas_src>

<mosaic_0001>
module attributes {stable_mosaic.version = 11 : i64} {
  func.func @_rnn_dropout_kernel(%arg0: i32, %arg1: i32, %arg2: memref<1x8x32xf32, #tpu.memory_space<vmem>>, %arg3: memref<2x32xf32, #tpu.memory_space<vmem>>, %arg4: memref<1x8x32xf32, #tpu.memory_space<vmem>>) attributes {dimension_semantics = [#tpu.dimension_semantics<parallel>, #tpu.dimension_semantics<parallel>], iteration_bounds = array<i64: 2, 1>, scalar_prefetch = 0 : i64, scratch_operands = 0 : i64, tpu.core_type = #tpu.core_type<tc>, window_params = [{transform_indices = @transform_0, window_bounds = array<i64: 1, 8, 32>}, {pipeline_mode = #tpu.pipeline_mode<synchronous>, transform_indices = @transform_1, window_bounds = array<i64: 2, 32>}, {transform_indices = @transform_2, window_bounds = array<i64: 1, 8, 32>}]} {
    %0 = arith.index_cast %arg0 : i32 to index
    %c0 = arith.constant 0 : index
    %1 = vector.load %arg3[%0, %c0] : memref<2x32xf32, #tpu.memory_space<vmem>>, vector<1x32xf32>
    %c0_0 = arith.constant 0 : index
    %c0_1 = arith.constant 0 : index
    %c0_2 = arith.constant 0 : index
    %2 = vector.load %arg2[%c0_0, %c0_1, %c0_2] : memref<1x8x32xf32, #tpu.memory_space<vmem>>, vector<1x8x32xf32>
    %3 = vector.shape_cast %1 : vector<1x32xf32> to vector<1x1x32xf32>
    %4 = vector.broadcast %3 : vector<1x1x32xf32> to vector<1x8x32xf32>
    %5 = arith.mulf %2, %4 : vector<1x8x32xf32>
    %c0_3 = arith.constant 0 : index
    %c0_4 = arith.constant 0 : index
    %c0_5 = arith.constant 0 : index
    %6 = vector.load %arg4[%c0_3, %c0_4, %c0_5] : memref<1x8x32xf32, #tpu.memory_space<vmem>>, vector<1x8x32xf32>
    tpu.vector_store %arg4[%c0_3, %c0_4, %c0_5], %5 {strides = array<i32>} : memref<1x8x32xf32, #tpu.memory_space<vmem>>, vector<1x8x32xf32>,
    return
  }
  func.func @transform_0(%arg0: i32, %arg1: i32) -> (i32, i32, i32) {
    %c0_i32 = arith.constant 0 : i32
    %c0_i32_0 = arith.constant 0 : i32
    return %arg0, %arg1, %c0_i32 : i32, i32, i32
  }
  func.func @transform_1(%arg0: i32, %arg1: i32) -> (i32, i32) {
    %c0_i32 = arith.constant 0 : i32
    %c0_i32_0 = arith.constant 0 : i32
    %c0_i32_1 = arith.constant 0 : i32
    return %c0_i32, %c0_i32_0 : i32, i32
  }
  func.func @transform_2(%arg0: i32, %arg1: i32) -> (i32, i32, i32) {
    %c0_i32 = arith.constant 0 : i32
    %c0_i32_0 = arith.constant 0 : i32
    return %arg0, %arg1, %c0_i32 : i32, i32, i32
  }
}

</mosaic_0001>

<bundles_post_ra>
// kernel: tpu_custom_call.1
= control target key start
LH: loop header
LB: loop body
LE: loop exit
PB: predicated region body
PF: predicated region fallthrough
CT: control target
= control target key end

     0   :  { %7 = vsyncpa [#allocation3], 0  ;;  %s711_s0 = inlined_call_operand.hbm [shape: f32[2,8,32], index: 0, kind: input, shape index: {}]   ;;  %s712_s1 = inlined_call_operand.hbm [shape: f32[2,32], index: 1, kind: input, shape index: {}]   ;;  %s713_s2 = inlined_call_operand.hbm [shape: f32[2,8,32], index: 2, kind: output, shape index: {}]  }
   0x1   :  { %9 = vsyncpa [#allocation3 + $0x1], 0 }
   0x2   :  { %10 = vsyncpa [#allocation6], 0 }
   0x3   :  { %11 = vsyncpa [#allocation4], 0 }
   0x4   :  { %13 = vsyncpa [#allocation4 + $0x1], 0  ;;  %s561_s9 = smov 0   ;;  %s563_s10 = smov 0  }
   0x5   :  { %s565_s11 = smov 0   ;;  %s567_s12 = smov 0  }
   0x6   :  { %s569_s13 = smov 0   ;;  %s571_s14 = smov 0  }
   0x7 LB: > { %s308_s15 = sadd.s32 4294967295, %s543_s14   ;;  %s309_s16 = sadd.s32 4294967294, %s543_s14   ;;  %s543_s14 = sphi %s571_s14, %s19_s14   ;;  %s539_s13 = sphi %s569_s13, %s725_s13   ;;  %s535_s12 = sphi %s567_s12, %s724_s12   ;;  %s531_s11 = sphi %s565_s11, %s723_s11   ;;  %s527_s10 = sphi %s563_s10, %s722_s10   ;;  %s523_s9 = sphi %s561_s9, %s721_s9  }
   0x8   : > { %p53_p0 = scmp.ne.s32.totalorder %s527_s10, %s523_s9  ;;  %p595_p1 = scmp.eq.s32.totalorder %s308_s15, 0 }
   0x9   : > { %p599_p2 = scmp.eq.s32.totalorder %s308_s15, 1  ;;  %p106_p3 = scmp.eq.s32.totalorder %s309_s16, 1 }
   0xa   : > { %p605_p4 = por %p595_p1, %p53_p0  ;;  %p310_p5 = scmp.ge.s32.totalorder %s543_s14, 1 }
   0xb   : > { %p610_p6 = por %p106_p3, %p53_p0  ;;  %p113_p7 = scmp.lt.s32.totalorder %s543_s14, 3 }
   0xc   : > { %s125_s23 = sshll.u32 %s712_s1, 4  ;;  %p312_p9 = scmp.ge.s32.totalorder %s543_s14, 2  ;;  %s126_s23 = int_to_ptr.hbm [resolvable:$true] %s125_s23 }
   0xd   : > { %p618_p8 = pnand %p310_p5, %p113_p7  ;;  %s545_s25 = smov [#allocation5]  }
   0xe   : > { %s127_s26 = sshll.u32 %s545_s25, 4  ;;  %s31_s27 = sadd.s32 1, %s539_s13  ;;  %s128_s26 = int_to_ptr.vmem [resolvable:$true] %s127_s26 }
   0xf   : > { %p331_p10 = pneg %p618_p8  ;;  %p33_p12 = scmp.ge.s32.totalorder %s31_s27, 2 }
  0x10   : > { %s40_s28 = sadd.s32 1, %s531_s11  ;;  %p47_p13 = scmp.ne.s32.totalorder %s531_s11, %s527_s10 }
  0x11   : > { %p332_p11 = pnand %p331_p10, %p595_p1  ;;  %p48_p0 = scmp.eq.s32.totalorder %s543_s14, 0 }
  0x12   : > { %s727_s27 = smov (%p33_p12, %s31_s27), 0  ;;  %p640_p5 = por %p599_p2, %p47_p13 }
  0x13   : > { %334 = dma.hbm_to_vmem [thread:$0]  (!%p332_p11), %s126_s23, 32, %s128_s26, [#allocation6]  }
  0x14   : > { %p634_p3 = por %p48_p0, %p47_p13  ;;  %s35_s3 = ssub.s32 %s539_s13, %s727_s27 }
  0x15   : > { %p344_p7 = scmp.lt.s32.totalorder %s543_s14, 2  ;;  %p38_p10 = scmp.eq.s32.totalorder %s35_s3, 0 }
  0x16   : > { %s138_s4 = sand.u32 1, %s531_s11   ;;  %s314_s7 = sshll.u32 %s539_s13, 3 }
  0x17   : > { %s313_s5 = sshll.u32 %s138_s4, 3  ;;  %s147_s16 = scalar_lea.hbm %s711_s0, %s314_s7 }
  0x18   : > { %s649_s6 = scalar_select %p38_p10, %s531_s11, %s40_s28  }
  0x19   : > { %s142_s21 = scalar_lea.vmem [#allocation2], %s313_s5  ;;  %s149_s18 = sshll.u32 %s147_s16, 4  ;;  %s150_s18 = int_to_ptr.hbm [resolvable:$true] %s149_s18 }
  0x1a   : > { %s151_s22 = sshll.u32 %s142_s21, 4  ;;  %p336_p2 = pnand %p344_p7, %p634_p3  ;;  %s152_s22 = int_to_ptr.vmem [resolvable:$true] %s151_s22 }
  0x1b   : > { %s139_s23 = scalar_lea.sflag [#allocation3], %s138_s4  ;;  %160 = sbr.rel (%p618_p8) target bundleno = 50 (0x32), region = 28 }
  0x1c   : > { %338 = dma.hbm_to_vmem [thread:$0]  (!%p336_p2), %s150_s18, 128, %s152_s22, %s139_s23  }
  0x1d   : > { %s660_s25 = sand.u32 (!%p618_p8), 1, %s527_s10  }
  0x1e   : > { %s316_s26 = sshll.u32 (!%p618_p8), %s660_s25, 3  ;;  %s163_s28 = scalar_lea.sflag (!%p618_p8), [#allocation3], %s660_s25 }
  0x1f   : > { %s166_s3 = scalar_lea.vmem (!%p618_p8), [#allocation2], %s316_s26 }
  0x20   : > { %510 = dma.done.wait (%p605_p4), %s163_s28, 128  }
  0x21   : > { %512 = vsyncadd (%p605_p4), %s163_s28, 4294967168 }
  0x22   : > { %514 = dma.done.wait (%p595_p1), [#allocation6], 32  }
  0x23   : > { %516 = vsyncadd (%p595_p1), [#allocation6], 4294967264  ;;  %s320_s24 = sshll.u32 %s535_s12, 3  ;;  %s192_s7 = scalar_lea.vmem [#allocation7], %s316_s26  ;;  %v195_v0 = vld [vmem:[%s166_s3] sm:$0xff]  ;;  %vm198_vm0 = vcmask 261120  }
  0x24   : > { %s212_s5 = scalar_lea.hbm %s713_s2, %s320_s24  ;;  %s214_s8 = sshll.u32 %s192_s7, 4  ;;  %s215_s8 = int_to_ptr.vmem [resolvable:$true] %s214_s8 }
  0x25   : > { %s216_s15 = sshll.u32 %s212_s5, 4  ;;  %s193_s19 = scalar_lea.vmem [#allocation5], %s535_s12  ;;  %s217_s15 = int_to_ptr.hbm [resolvable:$true] %s216_s15 }
  0x26   : > { %v396_v1 = vld [vmem:[%s193_s19] ss:$0 sm:$0xff]  ;;  %s201_s17 = scalar_lea.sflag [#allocation4], %s660_s25  ;;  %s471_s16 = sshra.s32 %s217_s15, 4  ;;  %s472_s16 = int_to_ptr.hbm [resolvable:$true] %s471_s16 }
  0x27   : > { %v197_v2 = vmul.f32 %v396_v1, %v195_v0  ;;  %s473_s21 = scalar_lea.hbm %s472_s16, 8  ;;  %s477_s23 = scalar_lea.hbm %s713_s2, 16 }
  0x28   : > { %p474_p1 = scmp.ne.s32.totalorder %s472_s16, %s473_s21  ;;  %p478_p11 = scmp.lt.s32.totalorder %s472_s16, %s713_s2 }
  0x29   : > { %199 = vst.msk [vmem:[%s192_s7] sm:$0xff] %vm198_vm0, %v197_v2  ;;  %p479_p12 = scmp.lt.s32.totalorder %s477_s23, %s473_s21 }
  0x2a   : > { %p475_p4 = pnand %p474_p1, %p640_p5 }
  0x2b   : > { %p480_p13 = por %p479_p12, %p478_p11 }
  0x2c   : > { %p476_p8 = pneg %p475_p4 }
  0x2e   : > { %p481_p0 = pnand %p480_p13, %p476_p8 }
  0x30   : > { %484 = shalt.err (!%p481_p0)
}
  0x31   : > { %329 = dma.vmem_to_hbm [thread:$0]  (%p640_p5), %s215_s8, 128, %s217_s15, %s201_s17  }
  0x32 PF: > { %s228_s25 = sand.u32 1, %s523_s9   ;;  %p340_p3 = pnand %p312_p9, %p610_p6 }
  0x33   : > { %s229_s28 = scalar_lea.sflag [#allocation4], %s228_s25 }
  0x34   : > { %p341_p7 = pneg %p340_p3 }
  0x36   : > { %518 = dma.done.wait (%p341_p7), %s229_s28, 128  }
  0x37   : > { %520 = vsyncadd (%p341_p7), %s229_s28, 4294967168  ;;  %s19_s14 = sadd.s32 1, %s543_s14   ;;  %s721_s9 = smov %s527_s10 }
  0x38   : > { %p16_p10 = scmp.ge.s32.totalorder %s19_s14, 4   ;;  %s722_s10 = smov %s531_s11 }
  0x39   : > { %s723_s11 = smov %s649_s6  ;;  %s724_s12 = smov %s539_s13 }
  0x3a   : > { %s725_s13 = smov %s727_s27  ;;  %18 = sbr.rel (!%p16_p10) target bundleno = 7 (0x7), region = 78 }
  0x3f   :  { %235 = vsyncpa [#allocation3], 1 }
  0x40   :  { %237 = vsyncpa [#allocation3 + $0x1], 1 }
  0x41   :  { %238 = vsyncpa [#allocation6], 1 }
  0x42   :  { %239 = vsyncpa [#allocation4], 1 }
  0x43   :  { %241 = vsyncpa [#allocation4 + $0x1], 1 }

</bundles_post_ra>
